<compile_context>
chip_gen: v5e
topology: v5e:2x2
jax: 0.10.0
libtpu: 0.0.40
codegen_flags: <defaults>
</compile_context>

<pallas_src>
import functools

import jax
import jax.numpy as jnp
from jax.experimental import pallas as pl
from jax.experimental.pallas import tpu as pltpu

_LANE = 128
_SUBLANE = 8
# Budget under which the whole [h_pad, tn] weight column block (plus x / out
# blocks, double-buffered) is kept resident. Conservative so it also fits
# comfortably inside v7x's 64 MiB physical VMEM.
_RESIDENT_VMEM_BUDGET = 24 * 1024 * 1024
_MAX_VMEM_LIMIT = 56 * 1024 * 1024


def _round_up(n, m):
    return ((n + m - 1) // m) * m


def _cdiv(a, b):
    return -(-a // b)


# --------------------------------------------------------------------------
# Parameter packing (done once at init time -- hoisted out of the forward).
# --------------------------------------------------------------------------
def pack_params(params, hidden_dim, latent_dim, rank, *, block_n=256,
                weight_dtype=jnp.bfloat16):
    """Pack fc_mu / fc_u / fc_d into one padded, pre-cast weight matrix.

    Weights are stored as [hidden, out] (transposed vs. PyTorch), biases as
    [1, out]. The fused output axis layout is
        [ mu (L) | u (L*rank) | zero pad ... | d (L) | zero pad ... ]
    with the d segment starting on a block_n boundary.
    """
    w_mu, b_mu, w_u, b_u, w_d, b_d = params
    L, LR = latent_dim, latent_dim * rank
    tn = block_n
    d_lo = _round_up(L + LR, tn)          # start of the d segment (tile aligned)
    n_pad = d_lo + _round_up(L, tn)       # total fused (padded) output width
    h_pad = _round_up(hidden_dim, _LANE)

    w = jnp.zeros((h_pad, n_pad), jnp.float32)
    w = w.at[:hidden_dim, :L].set(w_mu)
    w = w.at[:hidden_dim, L:L + LR].set(w_u)
    w = w.at[:hidden_dim, d_lo:d_lo + L].set(w_d)

    b = jnp.zeros((1, n_pad), jnp.float32)
    b = b.at[:, :L].set(b_mu)
    b = b.at[:, L:L + LR].set(b_u)
    b = b.at[:, d_lo:d_lo + L].set(b_d)

    # TODO(synk): for accuracy-critical downstream use of d (log-likelihoods at
    # large hidden_dim), pass weight_dtype=jnp.float32; bf16 halves weight HBM
    # traffic and is MXU-native on v6e/v7x.
    return {
        "w": w.astype(weight_dtype),   # [h_pad, n_pad], pre-cast once
        "b": b,                        # [1, n_pad] f32 (added post-accumulation)
        "hidden_dim": hidden_dim,
        "latent_dim": latent_dim,
        "rank": rank,
        "h_pad": h_pad,
        "n_pad": n_pad,
        "tn": tn,
        "d_lo": d_lo,
    }


# --------------------------------------------------------------------------
# Kernels
# --------------------------------------------------------------------------
def _kernel_weight_resident(x_ref, w_ref, b_ref, out_ref, *, first_d_tile):
    """Grid = (N tiles, B tiles); full hidden contraction per invocation.

    Batch axis is innermost, so each weight column block is DMA'd exactly once
    per call (its block index is constant across the inner axis).
    """
    j = pl.program_id(0)  # output (N) tile index
    # x is DMA'd as f32 and cast to the weight dtype here (VPU, hidden by MXU).
    y = jnp.dot(x_ref[...].astype(w_ref.dtype), w_ref[...],
                preferred_element_type=jnp.float32) + b_ref[...]

    @pl.when(j >= first_d_tile)
    def _():                      # d segment: d = exp(fc_d(x))
        out_ref[...] = jnp.exp(y)

    @pl.when(j < first_d_tile)
    def _():                      # mu / u segments: plain linear
        out_ref[...] = y


def _kernel_k_tiled(x_ref, w_ref, b_ref, out_ref, *, first_d_tile):
    """Grid = (B tiles, N tiles, K tiles); K last, accumulate into f32 out block."""
    j = pl.program_id(1)
    k = pl.program_id(2)
    partial = jnp.dot(x_ref[...].astype(w_ref.dtype), w_ref[...],
                      preferred_element_type=jnp.float32)

    @pl.when(k == 0)
    def _():
        out_ref[...] = partial

    @pl.when(k > 0)
    def _():
        out_ref[...] += partial

    @pl.when(k == pl.num_programs(2) - 1)
    def _():
        y = out_ref[...] + b_ref[...]

        @pl.when(j >= first_d_tile)
        def _():
            out_ref[...] = jnp.exp(y)

        @pl.when(j < first_d_tile)
        def _():
            out_ref[...] = y


# --------------------------------------------------------------------------
# Forward wrapper
# --------------------------------------------------------------------------
def lowrank_gaussian_forward(x, packed, *, block_m=256, block_k=512,
                             weight_resident=None, interpret=False):
    """x: [B, hidden_dim] float32. Returns (mu, u, d) matching the torch module."""
    B, H = x.shape
    assert H == packed["hidden_dim"]
    L = packed["latent_dim"]
    rank = packed["rank"]
    h_pad = packed["h_pad"]
    n_pad = packed["n_pad"]
    tn = packed["tn"]
    d_lo = packed["d_lo"]
    w = packed["w"]
    b = packed["b"]
    wbytes = jnp.dtype(w.dtype).itemsize

    # Balanced batch tiling (avoids a near-empty trailing tile for B just
    # above a block_m multiple).
    num_m = max(1, _cdiv(B, block_m))
    tm = _round_up(_cdiv(B, num_m), _SUBLANE)
    b_pad = tm * num_m

    num_n = n_pad // tn                  # always >= 2 (mu/u segment + d segment)
    first_d_tile = d_lo // tn

    # x stays f32 (cast happens inside the kernel).
    if b_pad > B or h_pad > H:
        x_p = jnp.pad(x, ((0, b_pad - B), (0, h_pad - H)))
    else:
        x_p = x

    out_bytes = 2 * tm * tn * 4
    bias_bytes = 2 * tn * 4
    resident_bytes = (2 * tm * h_pad * 4 + 2 * h_pad * tn * wbytes
                      + out_bytes + bias_bytes)
    if weight_resident is None:
        weight_resident = resident_bytes <= _RESIDENT_VMEM_BUDGET

    if weight_resident:
        grid = (num_n, num_m)
        kernel = functools.partial(_kernel_weight_resident,
                                   first_d_tile=first_d_tile)
        in_specs = [
            pl.BlockSpec((tm, h_pad), lambda j, i: (i, 0)),   # x tile (f32)
            pl.BlockSpec((h_pad, tn), lambda j, i: (0, j)),   # packed W column block
            pl.BlockSpec((1, tn), lambda j, i: (0, j)),       # packed bias (f32)
        ]
        out_spec = pl.BlockSpec((tm, tn), lambda j, i: (i, j))
        semantics = ("parallel", "parallel")
        needed = resident_bytes
    else:
        # K-tiled fallback for very large hidden_dim. Note: with the batch
        # axis outermost the weight stream repeats once per batch tile.
        tk = _LANE
        for cand in range(min(_round_up(block_k, _LANE), h_pad), _LANE - 1, -_LANE):
            if h_pad % cand == 0:
                tk = cand
                break
        num_k = h_pad // tk
        grid = (num_m, num_n, num_k)
        kernel = functools.partial(_kernel_k_tiled, first_d_tile=first_d_tile)
        in_specs = [
            pl.BlockSpec((tm, tk), lambda i, j, k: (i, k)),
            pl.BlockSpec((tk, tn), lambda i, j, k: (k, j)),
            pl.BlockSpec((1, tn), lambda i, j, k: (0, j)),
        ]
        out_spec = pl.BlockSpec((tm, tn), lambda i, j, k: (i, j))
        semantics = ("parallel", "parallel", "arbitrary")
        needed = 2 * tm * tk * 4 + 2 * tk * tn * wbytes + out_bytes + bias_bytes

    vmem_limit = int(min(_MAX_VMEM_LIMIT,
                         max(16 * 1024 * 1024, 2 * needed + 2 * 1024 * 1024)))

    out = pl.pallas_call(
        kernel,
        out_shape=jax.ShapeDtypeStruct((b_pad, n_pad), jnp.float32),
        grid_spec=pltpu.PrefetchScalarGridSpec(
            num_scalar_prefetch=0,
            grid=grid,
            in_specs=in_specs,
            out_specs=out_spec,
        ),
        compiler_params=pltpu.CompilerParams(
            dimension_semantics=semantics,
            vmem_limit_bytes=vmem_limit,
        ),
        interpret=interpret,
    )(x_p, w, b)

    mu = out[:B, :L]
    u = out[:B, L:L + L * rank].reshape(B, L, rank)
    d = out[:B, d_lo:d_lo + L]
    return mu, u, d


# --------------------------------------------------------------------------
# Synthetic init (PyTorch-Linear-like uniform bound) and reference
# --------------------------------------------------------------------------
def init_params(key, hidden_dim, latent_dim, rank):
    """Weights stored transposed vs. PyTorch as [hidden, out]; biases as [1, out]."""
    ks = jax.random.split(key, 6)
    bound = 1.0 / jnp.sqrt(hidden_dim)

    def uni(k, shape):
        return jax.random.uniform(k, shape, jnp.float32, -bound, bound)

    w_mu = uni(ks[0], (hidden_dim, latent_dim))
    b_mu = uni(ks[1], (1, latent_dim))
    w_u = uni(ks[2], (hidden_dim, latent_dim * rank))
    b_u = uni(ks[3], (1, latent_dim * rank))
    w_d = uni(ks[4], (hidden_dim, latent_dim))
    b_d = uni(ks[5], (1, latent_dim))
    return (w_mu, b_mu, w_u, b_u, w_d, b_d)


def _reference(x, params, latent_dim, rank):
    w_mu, b_mu, w_u, b_u, w_d, b_d = params
    B = x.shape[0]
    mu = x @ w_mu + b_mu
    u = (x @ w_u + b_u).reshape(B, latent_dim, rank)
    d = jnp.exp(x @ w_d + b_d)
    return mu, u, d


if __name__ == "__main__":
    # Config 1: toy shapes, weight-resident (default) path.
    B, hidden_dim, latent_dim, rank = 2, 32, 8, 2
    key = jax.random.PRNGKey(0)
    k_x, k_p, k_x2, k_p2 = jax.random.split(key, 4)

    x = jax.random.normal(k_x, (B, hidden_dim), jnp.float32)
    params = init_params(k_p, hidden_dim, latent_dim, rank)
    packed = pack_params(params, hidden_dim, latent_dim, rank)

    mu, u, d = lowrank_gaussian_forward(x, packed)
    jax.block_until_ready((mu, u, d))

    mu_ref, u_ref, d_ref = _reference(x, params, latent_dim, rank)
    assert mu.shape == (B, latent_dim)
    assert u.shape == (B, latent_dim, rank)
    assert d.shape == (B, latent_dim)
    # bf16 matmul operands -> compare against f32 reference with bf16 tolerance.
    assert jnp.allclose(mu, mu_ref, atol=5e-2, rtol=5e-2)
    assert jnp.allclose(u, u_ref, atol=5e-2, rtol=5e-2)
    assert jnp.allclose(d, d_ref, atol=5e-2, rtol=5e-2)

    # Config 2: uneven batch + larger hidden; exercise BOTH grid layouts,
    # including the K-tiled fallback with a multi-step reduction.
    B2, hidden2, latent2, rank2 = 9, 384, 8, 3
    x2 = jax.random.normal(k_x2, (B2, hidden2), jnp.float32)
    params2 = init_params(k_p2, hidden2, latent2, rank2)
    packed2 = pack_params(params2, hidden2, latent2, rank2)

    res_a = lowrank_gaussian_forward(x2, packed2)                       # resident
    res_b = lowrank_gaussian_forward(x2, packed2, weight_resident=False,
                                     block_k=128)                       # K-tiled
    jax.block_until_ready((res_a, res_b))

    mu2_ref, u2_ref, d2_ref = _reference(x2, params2, latent2, rank2)
    for got_mu, got_u, got_d in (res_a, res_b):
        assert got_mu.shape == (B2, latent2)
        assert got_u.shape == (B2, latent2, rank2)
        assert got_d.shape == (B2, latent2)
        assert jnp.allclose(got_mu, mu2_ref, atol=5e-2, rtol=5e-2)
        assert jnp.allclose(got_u, u2_ref, atol=5e-2, rtol=5e-2)
        assert jnp.allclose(got_d, d2_ref, atol=5e-2, rtol=5e-2)

    print("KERNEL_OK")
</pallas_src>

<mosaic_0001>
module attributes {stable_mosaic.version = 11 : i64} {
  func.func @_kernel_weight_resident(%arg0: i32, %arg1: i32, %arg2: memref<8x128xf32, #tpu.memory_space<vmem>>, %arg3: memref<128x256xbf16, #tpu.memory_space<vmem>>, %arg4: memref<1x256xf32, #tpu.memory_space<vmem>>, %arg5: memref<8x256xf32, #tpu.memory_space<vmem>>) attributes {dimension_semantics = [#tpu.dimension_semantics<parallel>, #tpu.dimension_semantics<parallel>], iteration_bounds = array<i64: 2, 1>, scalar_prefetch = 0 : i64, scratch_operands = 0 : i64, tpu.core_type = #tpu.core_type<tc>, window_params = [{transform_indices = @transform_0, window_bounds = array<i64: 8, 128>}, {transform_indices = @transform_1, window_bounds = array<i64: 128, 256>}, {transform_indices = @transform_2, window_bounds = array<i64: 1, 256>}, {transform_indices = @transform_3, window_bounds = array<i64: 8, 256>}]} {
    %c0 = arith.constant 0 : index
    %c0_0 = arith.constant 0 : index
    %0 = vector.load %arg2[%c0, %c0_0] : memref<8x128xf32, #tpu.memory_space<vmem>>, vector<8x128xf32>
    %1 = arith.truncf %0 : vector<8x128xf32> to vector<8x128xbf16>
    %c0_1 = arith.constant 0 : index
    %c0_2 = arith.constant 0 : index
    %2 = vector.load %arg3[%c0_1, %c0_2] : memref<128x256xbf16, #tpu.memory_space<vmem>>, vector<128x256xbf16>
    %cst = arith.constant dense<0.000000e+00> : vector<8x256xf32>
    %3 = tpu.matmul %1, %2, %cst {dimension_numbers = #tpu.dot_dimension_numbers<[1], [0], [0], [1], [0, 0, 1, 1], [], []>} : vector<8x128xbf16>, vector<128x256xbf16>, vector<8x256xf32> -> vector<8x256xf32>
    %c0_3 = arith.constant 0 : index
    %c0_4 = arith.constant 0 : index
    %4 = vector.load %arg4[%c0_3, %c0_4] : memref<1x256xf32, #tpu.memory_space<vmem>>, vector<1x256xf32>
    %5 = vector.broadcast %4 : vector<1x256xf32> to vector<8x256xf32>
    %6 = arith.addf %3, %5 : vector<8x256xf32>
    %c1_i32 = arith.constant 1 : i32
    %7 = arith.cmpi sge, %arg0, %c1_i32 : i32
    %8 = arith.extui %7 : i1 to i32
    %c0_i32 = arith.constant 0 : i32
    %9 = arith.cmpi ne, %8, %c0_i32 : i32
    scf.if %9 {
      %13 = math.exp %6 : vector<8x256xf32>
      %c0_7 = arith.constant 0 : index
      %c0_8 = arith.constant 0 : index
      %14 = vector.load %arg5[%c0_7, %c0_8] : memref<8x256xf32, #tpu.memory_space<vmem>>, vector<8x256xf32>
      tpu.vector_store %arg5[%c0_7, %c0_8], %13 {strides = array<i32>} : memref<8x256xf32, #tpu.memory_space<vmem>>, vector<8x256xf32>,
    } else {
    }
    %c1_i32_5 = arith.constant 1 : i32
    %10 = arith.cmpi slt, %arg0, %c1_i32_5 : i32
    %11 = arith.extui %10 : i1 to i32
    %c0_i32_6 = arith.constant 0 : i32
    %12 = arith.cmpi ne, %11, %c0_i32_6 : i32
    scf.if %12 {
      %c0_7 = arith.constant 0 : index
      %c0_8 = arith.constant 0 : index
      %13 = vector.load %arg5[%c0_7, %c0_8] : memref<8x256xf32, #tpu.memory_space<vmem>>, vector<8x256xf32>
      tpu.vector_store %arg5[%c0_7, %c0_8], %6 {strides = array<i32>} : memref<8x256xf32, #tpu.memory_space<vmem>>, vector<8x256xf32>,
    } else {
    }
    return
  }
  func.func @transform_0(%arg0: i32, %arg1: i32) -> (i32, i32) {
    %c0_i32 = arith.constant 0 : i32
    %c0_i32_0 = arith.constant 0 : i32
    return %arg1, %c0_i32 : i32, i32
  }
  func.func @transform_1(%arg0: i32, %arg1: i32) -> (i32, i32) {
    %c0_i32 = arith.constant 0 : i32
    %c0_i32_0 = arith.constant 0 : i32
    return %c0_i32, %arg0 : i32, i32
  }
  func.func @transform_2(%arg0: i32, %arg1: i32) -> (i32, i32) {
    %c0_i32 = arith.constant 0 : i32
    %c0_i32_0 = arith.constant 0 : i32
    return %c0_i32, %arg0 : i32, i32
  }
  func.func @transform_3(%arg0: i32, %arg1: i32) -> (i32, i32) {
    %c0_i32 = arith.constant 0 : i32
    return %arg1, %arg0 : i32, i32
  }
}

</mosaic_0001>

<bundles_post_ra>
// kernel: tpu_custom_call.1
= control target key start
LH: loop header
LB: loop body
LE: loop exit
PB: predicated region body
PF: predicated region fallthrough
CT: control target
= control target key end

     0   :  { %8 = vsyncpa [#allocation3], 0  ;;  %s1149_s0 = inlined_call_operand.hbm [shape: f32[8,128], index: 0, kind: input, shape index: {}]   ;;  %s1150_s1 = inlined_call_operand.hbm [shape: bf16[128,512], index: 1, kind: input, shape index: {}]   ;;  %s1151_s2 = inlined_call_operand.hbm [shape: f32[1,512], index: 2, kind: input, shape index: {}]   ;;  %s1152_s3 = inlined_call_operand.hbm [shape: f32[8,512], index: 3, kind: output, shape index: {}]  }
   0x1   :  { %9 = vsyncpa [#allocation6], 0 }
   0x2   :  { %11 = vsyncpa [#allocation6 + $0x1], 0 }
   0x3   :  { %12 = vsyncpa [#allocation4], 0 }
   0x4   :  { %14 = vsyncpa [#allocation4 + $0x1], 0  ;;  %s937_s12 = smov 0   ;;  %s939_s13 = smov 0  }
   0x5   :  { %s941_s14 = smov 0   ;;  %s943_s15 = smov 0  }
   0x6   :  { %s945_s16 = smov 0   ;;  %s947_s17 = smov 0  }
   0x7 LB: > { %s32_s18 = sadd.s32 1, %s907_s16  ;;  %s65_s19 = sadd.s32 1, %s899_s14  ;;  %s911_s17 = sphi %s947_s17, %s20_s17   ;;  %s907_s16 = sphi %s945_s16, %s1163_s16   ;;  %s903_s15 = sphi %s943_s15, %s1162_s15   ;;  %s899_s14 = sphi %s941_s14, %s1161_s14   ;;  %s895_s13 = sphi %s939_s13, %s1160_s13   ;;  %s891_s12 = sphi %s937_s12, %s1159_s12  }
   0x8   : > { %p34_p0 = scmp.ge.s32.totalorder %s32_s18, 2  ;;  %p72_p1 = scmp.ne.s32.totalorder %s899_s14, %s895_s13 }
   0x9   : > { %p73_p2 = scmp.eq.s32.totalorder %s911_s17, 0  ;;  %p550_p3 = scmp.ge.s32.totalorder %s911_s17, 2 }
   0xa   : > { %s1165_s18 = smov (%p34_p0, %s32_s18), 0  ;;  %p676_p5 = scmp.lt.s32.totalorder %s911_s17, 2 }
   0xb   : > { %p978_p4 = por %p73_p2, %p72_p1  ;;  %s62_s21 = ssub.s32 %s907_s16, %s1165_s18 }
   0xc   : > { %s170_s22 = sand.u32 1, %s911_s17   ;;  %p63_p6 = scmp.eq.s32.totalorder %s62_s21, 0 }
   0xd   : > { %s172_s23 = sand.u32 1, %s899_s14   ;;  %s632_s24 = sshll.u32 %s907_s16, 3 }
   0xe   : > { %s989_s25 = scalar_select %p63_p6, %s899_s14, %s65_s19  }
   0xf   : > { %s551_s26 = sshll.u32 %s172_s23, 7  ;;  %s179_s29 = scalar_lea.hbm %s1150_s1, %s632_s24 }
  0x10   : > { %s180_s30 = sshll.u32 %s179_s29, 4  ;;  %s174_s4 = scalar_lea.vmem [#allocation5], %s551_s26  ;;  %s181_s30 = int_to_ptr.hbm [resolvable:$true] %s180_s30 }
  0x11   : > { %s182_s5 = sshll.u32 %s174_s4, 4  ;;  %p1000_p7 = pnand %p676_p5, %p978_p4  ;;  %s183_s5 = int_to_ptr.vmem [resolvable:$true] %s182_s5 }
  0x12   : > { %s1004_s7 = scalar_lea.sflag [#allocation6], %s170_s22  ;;  %s913_s8 = smov 256  }
  0x13   : > { %s914_s9 = smov 128   ;;  %s915_s10 = smov 8  }
  0x14   : > { %667 = dma.hbm_to_vmem [thread:$0]  (!%p1000_p7), %s181_s30, 2048, %s183_s5, %s1004_s7, %s913_s8, %s914_s9, %s915_s10  }
  0x15   : > { %s1010_s11 = sadd.s32 4294967295, %s911_s17   ;;  %s547_s19 = sadd.s32 4294967294, %s911_s17  }
  0x16   : > { %p78_p8 = scmp.ne.s32.totalorder %s895_s13, %s891_s12  ;;  %p79_p9 = scmp.eq.s32.totalorder %s1010_s11, 0 }
  0x17   : > { %p130_p10 = scmp.eq.s32.totalorder %s1010_s11, 1  ;;  %p136_p11 = scmp.eq.s32.totalorder %s547_s19, 1 }
  0x18   : > { %p1019_p12 = por %p79_p9, %p78_p8  ;;  %p548_p13 = scmp.ge.s32.totalorder %s911_s17, 1 }
  0x19   : > { %p1027_p0 = por %p130_p10, %p72_p1  ;;  %p1031_p2 = por %p136_p11, %p78_p8 }
  0x1a   : > { %p143_p4 = scmp.lt.s32.totalorder %s911_s17, 3  ;;  %s157_s27 = sshll.u32 %s1149_s0, 4  ;;  %s158_s27 = int_to_ptr.hbm [resolvable:$true] %s157_s27 }
  0x1b   : > { %s916_s29 = smov [#allocation2]   ;;  %s554_s4 = sshll.u32 %s172_s23, 1 }
  0x1c   : > { %p1039_p5 = pnand %p548_p13, %p143_p4  ;;  %s159_s30 = sshll.u32 %s916_s29, 4  ;;  %s160_s30 = int_to_ptr.vmem [resolvable:$true] %s159_s30 }
  0x1d   : > { %s555_s5 = sshll.u32 %s907_s16, 1  ;;  %s196_s24 = scalar_lea.vmem [#allocation7], %s554_s4 }
  0x1e   : > { %p660_p1 = pneg %p1039_p5  ;;  %s200_s10 = scalar_lea.hbm %s1151_s2, %s555_s5 }
  0x1f   : > { %s202_s19 = sshll.u32 %s200_s10, 4  ;;  %s204_s26 = sshll.u32 %s196_s24, 4  ;;  %s203_s19 = int_to_ptr.hbm [resolvable:$true] %s202_s19  ;;  %s205_s26 = int_to_ptr.vmem [resolvable:$true] %s204_s26 }
  0x20   : > { %p661_p6 = pnand %p660_p1, %p79_p9  ;;  %213 = sbr.rel (%p1039_p5) target bundleno = 246 (0xf6), region = 32 }
  0x21   : > { %670 = dma.hbm_to_vmem [thread:$0]  (!%p1000_p7), %s203_s19, 32, %s205_s26, %s1004_s7  }
  0x22   : > { %663 = dma.hbm_to_vmem [thread:$0]  (!%p661_p6), %s158_s27, 128, %s160_s30, [#allocation3]  }
  0x25   : > { %878 = dma.done.wait (%p79_p9), [#allocation3], 128  }
  0x26   : > { %880 = vsyncadd (%p79_p9), [#allocation3], 4294967168  ;;  %s220_s23 = sand.u32 1, %s1010_s11   ;;  %s1064_s29 = sand.u32 1, %s895_s13  }
  0x27   : > { %s558_s27 = sshll.u32 %s1064_s29, 7  ;;  %s221_s30 = scalar_lea.sflag [#allocation6], %s220_s23 }
  0x28   : > { %s1067_s6 = scalar_lea.vmem [#allocation5], %s558_s27 }
  0x29   : > { %882 = dma.done.wait (%p1019_p12), %s221_s30, 2080  }
  0x2a   : > { %884 = vsyncadd (%p1019_p12), %s221_s30, 4294965216  ;;  %s560_s7 = sshll.u32 %s1064_s29, 4  ;;  %v619_v0 = vld [vmem:[%s1067_s6 + $0x70] sm:$0xf]  ;;  %v648_v1 = vld [vmem:[%s1067_s6 + $0x74] sm:$0xf0] }
  0x2b   : > { %v647_v2 = vld [vmem:[%s1067_s6 + $0x74] sm:$0xf]  ;;  %v620_v3 = vor.u32 %v648_v1, %v619_v0  ;;  %v621_v4 = vld [vmem:[%s1067_s6 + $0x78] sm:$0xf0]  ;;  %v611_v5 = vld [vmem:[%s1067_s6 + $0x60] sm:$0xf] }
  0x2c   : > { %v646_v6 = vld [vmem:[%s1067_s6 + $0x64] sm:$0xf0]  ;;  %v624_v7 = vor.u32 %v647_v2, %v621_v4  ;;  %v645_v8 = vld [vmem:[%s1067_s6 + $0x64] sm:$0xf]  ;;  %v613_v9 = vld [vmem:[%s1067_s6 + $0x68] sm:$0xf0] }
  0x2d   : > { %370 = vmatpush.bf16.msra.mxu0 %v620_v3  ;;  %v612_v10 = vor.u32 %v646_v6, %v611_v5  ;;  %v616_v11 = vor.u32 %v645_v8, %v613_v9  ;;  %v603_v12 = vld [vmem:[%s1067_s6 + $0x50] sm:$0xf]  ;;  %v644_v13 = vld [vmem:[%s1067_s6 + $0x54] sm:$0xf0]  ;;  %v643_v14 = vld [vmem:[%s1067_s6 + $0x54] sm:$0xf] }
  0x2e   : > { %383 = vmatpush.bf16.msra.mxu1 %v624_v7  ;;  %v605_v15 = vld [vmem:[%s1067_s6 + $0x58] sm:$0xf0]  ;;  %v604_v16 = vor.u32 %v644_v13, %v603_v12  ;;  %v595_v18 = vld [vmem:[%s1067_s6 + $0x40] sm:$0xf]  ;;  %v642_v19 = vld [vmem:[%s1067_s6 + $0x44] sm:$0xf0] }
  0x2f   : > { %v608_v17 = vor.u32 %v643_v14, %v605_v15  ;;  %v641_v20 = vld [vmem:[%s1067_s6 + $0x44] sm:$0xf]  ;;  %v597_v21 = vld [vmem:[%s1067_s6 + $0x48] sm:$0xf0]  ;;  %v596_v22 = vor.u32 %v642_v19, %v595_v18  ;;  %v587_v24 = vld [vmem:[%s1067_s6 + $0x30] sm:$0xf] }
  0x30   : > { %v600_v23 = vor.u32 %v641_v20, %v597_v21  ;;  %v640_v25 = vld [vmem:[%s1067_s6 + $0x34] sm:$0xf0]  ;;  %v639_v26 = vld [vmem:[%s1067_s6 + $0x34] sm:$0xf]  ;;  %v589_v27 = vld [vmem:[%s1067_s6 + $0x38] sm:$0xf0] }
  0x31   : > { %371 = vmatpush.bf16.msra.mxu0 %v612_v10  ;;  %v588_v28 = vor.u32 %v640_v25, %v587_v24  ;;  %v592_v29 = vor.u32 %v639_v26, %v589_v27  ;;  %v579_v30 = vld [vmem:[%s1067_s6 + $0x20] sm:$0xf]  ;;  %v638_v31 = vld [vmem:[%s1067_s6 + $0x24] sm:$0xf0]  ;;  %v637_v32 = vld [vmem:[%s1067_s6 + $0x24] sm:$0xf] }
  0x32   : > { %384 = vmatpush.bf16.msra.mxu1 %v616_v11  ;;  %v581_v33 = vld [vmem:[%s1067_s6 + $0x28] sm:$0xf0]  ;;  %v580_v34 = vor.u32 %v638_v31, %v579_v30  ;;  %v571_v36 = vld [vmem:[%s1067_s6 + $0x10] sm:$0xf]  ;;  %v636_v37 = vld [vmem:[%s1067_s6 + $0x14] sm:$0xf0] }
  0x33   : > { %v584_v35 = vor.u32 %v637_v32, %v581_v33  ;;  %v635_v38 = vld [vmem:[%s1067_s6 + $0x14] sm:$0xf]  ;;  %v573_v39 = vld [vmem:[%s1067_s6 + $0x18] sm:$0xf0]  ;;  %v572_v40 = vor.u32 %v636_v37, %v571_v36  ;;  %v563_v42 = vld [vmem:[%s1067_s6] sm:$0xf] }
  0x34   : > { %v576_v41 = vor.u32 %v635_v38, %v573_v39  ;;  %v634_v43 = vld [vmem:[%s1067_s6 + $0x4] sm:$0xf0]  ;;  %v633_v44 = vld [vmem:[%s1067_s6 + $0x4] sm:$0xf]  ;;  %v565_v45 = vld [vmem:[%s1067_s6 + $0x8] sm:$0xf0] }
  0x35   : > { %372 = vmatpush.bf16.msra.mxu0 %v604_v16  ;;  %v564_v46 = vor.u32 %v634_v43, %v563_v42  ;;  %v266_v47 = vld [vmem:[#allocation2] sm:$0xff]  ;;  %v568_v48 = vor.u32 %v633_v44, %v565_v45  ;;  %s559_s11 = sshll.u32 %s1064_s29, 1  ;;  %s262_s28 = scalar_lea.vmem [#allocation8], %s560_s7 }
  0x36   : > { %385 = vmatpush.bf16.msra.mxu1 %v608_v17  ;;  %v267_v49 = vpack.c.bf16 %v266_v47, %v266_v47  ;;  %s234_s20 = scalar_lea.vmem [#allocation7], %s559_s11  ;;  %p625_p7 = scmp.lt.s32.totalorder %s903_s15, 1 }
  0x37   : > { %v284_v50 = vld [vmem:[%s234_s20] sm:$0x3] }
  0x38   : > { %v286_v51 = vperm.slane %v284_v50, 0  ;;  %v287_v52 = vperm.slane %v284_v50, 1 }
  0x39   : > { %373 = vmatpush.bf16.msra.mxu0 %v596_v22 }
  0x3a   : > { %386 = vmatpush.bf16.msra.mxu1 %v600_v23 }
  0x3d   : > { %374 = vmatpush.bf16.msra.mxu0 %v588_v28 }
  0x3e   : > { %387 = vmatpush.bf16.msra.mxu1 %v592_v29 }
  0x41   : > { %375 = vmatpush.bf16.msra.mxu0 %v580_v34 }
  0x42   : > { %388 = vmatpush.bf16.msra.mxu1 %v584_v35 }
  0x45   : > { %376 = vmatpush.bf16.msra.mxu0 %v572_v40 }
  0x46   : > { %389 = vmatpush.bf16.msra.mxu1 %v576_v41 }
  0x49   : > { %377 = vmatpush.bf16.msra.mxu0 %v564_v46 }
  0x4a   : > { %390 = vmatpush.bf16.msra.mxu1 %v568_v48 }
  0x4c   : > { %378 = vmatmul.bf16.vlgmr.msra.gmra.mxu0 %v267_v49 }
  0x4d   : > { %391 = vmatmul.bf16.vlgmr.msra.gmra.mxu1 %v267_v49 }
  0xc9   : > { %v379_v53 = vpop.f32.mrf.mxu0 }
  0xca   : > { %v380_v54 = vadd.f32 %v379_v53, %v286_v51  ;;  %v392_v55 = vpop.f32.mrf.mxu1 }
  0xcb   : > { %v393_v56 = vadd.f32 %v392_v55, %v287_v52 }
  0xce   : > { %399 = sbr.rel (%p625_p7) target bundleno = 222 (0xde), region = 48 }
  0xd1   : > { %v381_v57 = vpop.f32.mrf.mxu0 }
  0xd2   : > { %v394_v58 = vpop.f32.mrf.mxu1 }
  0xd3   : > { %v400_v59 = vmul.f32 1.442695, %v380_v54  ;;  %v402_v60 = vmul.f32 1.442695, %v393_v56 }
  0xd5   : > { %731 = vpow2.f32 %v400_v59 }
  0xd6   : > { %733 = vpow2.f32 %v402_v60 }
  0xdb   : > { %v732_v61 = vpop.eup %731 }
  0xdc   : > { %v734_v62 = vpop.eup %733  ;;  %404 = vst [vmem:[%s262_s28] sm:$0xff] %v732_v61 }
  0xdd   : > { %405 = vst [vmem:[%s262_s28 + $0x8] sm:$0xff] %v734_v62 }
  0xde PF: > { %p626_p8 = scmp.ge.s32.totalorder %s903_s15, 1 }
  0xe0   : > { %409 = sbr.rel (%p626_p8) target bundleno = 231 (0xe7), region = 52 }
  0xe5   : > { %410 = vst [vmem:[%s262_s28] sm:$0xff] %v380_v54 }
  0xe6   : > { %411 = vst [vmem:[%s262_s28 + $0x8] sm:$0xff] %v393_v56 }
  0xe7 PF: > { %s649_s4 = sshll.u32 %s903_s15, 4  ;;  %s428_s10 = sshll.u32 %s262_s28, 4  ;;  %s429_s10 = int_to_ptr.vmem [resolvable:$true] %s428_s10 }
  0xe8   : > { %s426_s9 = scalar_lea.hbm %s1152_s3, %s649_s4  ;;  %s413_s24 = scalar_lea.sflag [#allocation4], %s1064_s29 }
  0xe9   : > { %s430_s19 = sshll.u32 %s426_s9, 4  ;;  %s845_s15 = scalar_lea.hbm %s1152_s3, 32  ;;  %s431_s19 = int_to_ptr.hbm [resolvable:$true] %s430_s19 }
  0xea   : > { %s839_s26 = sshra.s32 %s431_s19, 4  ;;  %s840_s26 = int_to_ptr.hbm [resolvable:$true] %s839_s26 }
  0xeb   : > { %s841_s23 = scalar_lea.hbm %s840_s26, 16  ;;  %p846_p12 = scmp.lt.s32.totalorder %s840_s26, %s1152_s3 }
  0xec   : > { %p842_p9 = scmp.ne.s32.totalorder %s840_s26, %s841_s23  ;;  %p847_p13 = scmp.lt.s32.totalorder %s845_s15, %s841_s23 }
  0xee   : > { %p843_p10 = pnand %p842_p9, %p1027_p0  ;;  %p848_p4 = por %p847_p13, %p846_p12 }
  0xf0   : > { %p844_p11 = pneg %p843_p10 }
  0xf2   : > { %p849_p5 = pnand %p848_p4, %p844_p11 }
  0xf4   : > { %852 = shalt.err (!%p849_p5)
}
  0xf5   : > { %658 = dma.vmem_to_hbm [thread:$0]  (%p1027_p0), %s429_s10, 256, %s431_s19, %s413_s24  }
  0xf6 PF: > { %s442_s29 = sand.u32 1, %s891_s12   ;;  %p672_p1 = pnand %p550_p3, %p1031_p2 }
  0xf7   : > { %s443_s11 = scalar_lea.sflag [#allocation4], %s442_s29 }
  0xf8   : > { %p673_p6 = pneg %p672_p1 }
  0xfa   : > { %886 = dma.done.wait (%p673_p6), %s443_s11, 256  }
  0xfb   : > { %888 = vsyncadd (%p673_p6), %s443_s11, 4294967040  ;;  %s20_s17 = sadd.s32 1, %s911_s17   ;;  %s1159_s12 = smov %s895_s13 }
  0xfc   : > { %p17_p7 = scmp.ge.s32.totalorder %s20_s17, 4   ;;  %s1160_s13 = smov %s899_s14 }
  0xfd   : > { %s1161_s14 = smov %s989_s25  ;;  %s1162_s15 = smov %s907_s16 }
  0xfe   : > { %s1163_s16 = smov %s1165_s18  ;;  %19 = sbr.rel (!%p17_p7) target bundleno = 7 (0x7), region = 102 }
 0x103   :  { %449 = vsyncpa [#allocation3], 1 }
 0x104   :  { %451 = vsyncpa [#allocation3 + $0x1], 1 }
 0x105   :  { %452 = vsyncpa [#allocation6], 1 }
 0x106   :  { %454 = vsyncpa [#allocation6 + $0x1], 1 }
 0x107   :  { %455 = vsyncpa [#allocation4], 1 }
 0x108   :  { %457 = vsyncpa [#allocation4 + $0x1], 1 }

</bundles_post_ra>
